<compile_context>
chip_gen: v5e
topology: v5e:2x2
jax: 0.10.0
libtpu: 0.0.40
codegen_flags: <defaults>
</compile_context>

<pallas_src>
import functools

import jax
import jax.numpy as jnp
from jax.experimental import pallas as pl
from jax.experimental.pallas import tpu as pltpu


def _round_up(x, m):
    return ((x + m - 1) // m) * m


def _tensorcores_per_chip():
    """Best-effort count of TensorCores per chip (v7x: 2, earlier gens: 1)."""
    try:
        kind = jax.devices()[0].device_kind.lower()
        if "v7" in kind:
            return 2
    except Exception:
        pass
    return 1


def prepare_attention_params(wq, wk, wv, wo, bo, *, heads, dim_head):
    """One-time (init) weight preparation.

    wq/wk/wv: (inner, D)  PyTorch Linear layout (out, in)
    wo      : (D, inner)
    bo      : (D,)
    Returns kernel-ready arrays:
      wqkv: (D, heads*3*hsec) bf16; per-head column sections [q|k|v], each
            padded to hsec = round_up(dim_head, 128) lanes; scale folded into q.
      wo  : (heads*hsec, D)  bf16; per-head row blocks padded to hsec.
      bo  : (1, D) f32.
    """
    inner, D = wq.shape
    assert inner == heads * dim_head
    scale = dim_head ** -0.5
    hsec = _round_up(dim_head, 128)

    def per_head(w_t):          # (D, inner) -> (D, heads, hsec), zero-padded
        w3 = w_t.reshape(D, heads, dim_head)
        return jnp.pad(w3, ((0, 0), (0, 0), (0, hsec - dim_head)))

    wq3 = per_head(wq.T * scale)          # fold 1/sqrt(dim_head) into Q weights
    wk3 = per_head(wk.T)
    wv3 = per_head(wv.T)
    wqkv = jnp.stack([wq3, wk3, wv3], axis=2).reshape(D, heads * 3 * hsec)

    wo3 = wo.T.reshape(heads, dim_head, D)
    wo_p = jnp.pad(wo3, ((0, 0), (0, hsec - dim_head), (0, 0)))
    wo_p = wo_p.reshape(heads * hsec, D)

    return dict(
        wqkv=wqkv.astype(jnp.bfloat16),
        wo=wo_p.astype(jnp.bfloat16),
        bo=bo.reshape(1, D).astype(jnp.float32),
        heads=heads,
        dim_head=dim_head,
        hsec=hsec,
    )


def _attn_kernel(x_ref, wqkv_ref, wo_ref, bo_ref, o_ref, *, heads, hsec):
    """One grid step = full multi-head attention for `bb` batch elements.

    x_ref    : (bb, S, D)            bf16
    wqkv_ref : (D, heads*3*hsec)     bf16  per-head [q|k|v] 128-lane sections
    wo_ref   : (heads*hsec, D)       bf16  per-head row blocks (padded rows = 0)
    bo_ref   : (1, D)                f32
    o_ref    : (bb, S, D)            f32
    """
    bb, S, D = o_ref.shape

    for b in range(bb):                                        # static (bb <= 2)
        x = x_ref[b]                                           # (S, D) bf16

        # Single fused QKV projection for all heads (MXU, f32 accumulation).
        qkv = jnp.dot(x, wqkv_ref[...],
                      preferred_element_type=jnp.float32)      # (S, heads*3*hsec)

        acc = jnp.zeros((S, D), jnp.float32) + bo_ref[...]     # bias-initialized

        for h in range(heads):                                 # static unroll
            base = 3 * hsec * h                                # 128-aligned
            q = qkv[:, base:base + hsec].astype(jnp.bfloat16)  # scale pre-folded
            k = qkv[:, base + hsec:base + 2 * hsec].astype(jnp.bfloat16)
            v = qkv[:, base + 2 * hsec:base + 3 * hsec].astype(jnp.bfloat16)

            # Scores: contract the head dim directly (no materialized k^T).
            s = jax.lax.dot_general(
                q, k, (((1,), (1,)), ((), ())),
                preferred_element_type=jnp.float32)            # (S, S) f32

            # f32 softmax; EUP approx reciprocal for the denominator.
            s = s - jnp.max(s, axis=-1, keepdims=True)
            p = jnp.exp(s)
            p = p * pl.reciprocal(jnp.sum(p, axis=-1, keepdims=True), approx=True)

            ctx = jnp.dot(p.astype(jnp.bfloat16), v,
                          preferred_element_type=jnp.float32)  # (S, hsec) f32

            # Per-head output-projection accumulation (no concat, bounded live
            # ranges); zero-padded ctx lanes meet zero-padded wo rows -> inert.
            acc = acc + jnp.dot(ctx.astype(jnp.bfloat16),
                                wo_ref[h * hsec:(h + 1) * hsec, :],
                                preferred_element_type=jnp.float32)

        o_ref[b] = acc


def attention_forward(x, params):
    """x: (B, S, D) float32; params from prepare_attention_params.
    Returns (B, S, D) float32."""
    B, S, D = x.shape
    heads, hsec = params["heads"], params["hsec"]
    wqkv, wo, bo = params["wqkv"], params["wo"], params["bo"]
    qkv_w = wqkv.shape[1]

    # One "parallel" grid step per TensorCore: single-TC chips (v5e/v6e) run a
    # single step over all batches; v7x splits the batch across its 2 cores.
    ncores = _tensorcores_per_chip()
    grid_b = ncores if (ncores > 1 and B % ncores == 0) else 1
    bb = B // grid_b
    # TODO(synk): if B == 1 on v7x, split the sequence axis across cores instead.

    kernel = functools.partial(_attn_kernel, heads=heads, hsec=hsec)

    return pl.pallas_call(
        kernel,
        out_shape=jax.ShapeDtypeStruct((B, S, D), jnp.float32),
        grid_spec=pltpu.PrefetchScalarGridSpec(
            num_scalar_prefetch=0,
            grid=(grid_b,),
            in_specs=[
                # x: bb batch elements per step.
                pl.BlockSpec((bb, S, D), lambda b: (b, 0, 0)),
                # Weights/bias: constant block index -> VMEM-resident all grid.
                pl.BlockSpec((D, qkv_w), lambda b: (0, 0)),
                pl.BlockSpec((heads * hsec, D), lambda b: (0, 0)),
                pl.BlockSpec((1, D), lambda b: (0, 0)),
            ],
            out_specs=pl.BlockSpec((bb, S, D), lambda b: (b, 0, 0)),
        ),
        compiler_params=pltpu.CompilerParams(
            dimension_semantics=("parallel",)),   # v7x: one batch per TC
    )(x.astype(jnp.bfloat16), wqkv, wo, bo)


def attention_reference(x, wq, wk, wv, wo, bo, *, heads, dim_head):
    """Pure-JAX f32 reference reproducing the default AttnProcessor semantics."""
    B, S, D = x.shape
    scale = dim_head ** -0.5

    def split_heads(t):                       # (B, S, inner) -> (B, H, S, dh)
        return t.reshape(B, S, heads, dim_head).transpose(0, 2, 1, 3)

    q = split_heads(x @ wq.T)
    k = split_heads(x @ wk.T)
    v = split_heads(x @ wv.T)
    scores = jnp.einsum('bhqe,bhke->bhqk', q, k) * scale
    probs = jax.nn.softmax(scores, axis=-1)
    ctx = jnp.einsum('bhqk,bhke->bhqe', probs, v)
    ctx = ctx.transpose(0, 2, 1, 3).reshape(B, S, heads * dim_head)
    return ctx @ wo.T + bo.reshape(1, 1, D)


if __name__ == "__main__":
    # Module config: Attention(query_dim=32, heads=2, dim_head=16)
    B, S = 2, 8
    query_dim, heads, dim_head = 32, 2, 16
    inner_dim = heads * dim_head

    key = jax.random.PRNGKey(0)
    kx, kq, kk, kv, ko, kb = jax.random.split(key, 6)

    x = jax.random.normal(kx, (B, S, query_dim), dtype=jnp.float32)

    # PyTorch Linear layout: weight is (out_features, in_features); y = x @ W^T.
    wq = jax.random.normal(kq, (inner_dim, query_dim), dtype=jnp.float32) * 0.05
    wk = jax.random.normal(kk, (inner_dim, query_dim), dtype=jnp.float32) * 0.05
    wv = jax.random.normal(kv, (inner_dim, query_dim), dtype=jnp.float32) * 0.05
    wo = jax.random.normal(ko, (query_dim, inner_dim), dtype=jnp.float32) * 0.05
    bo = jax.random.normal(kb, (query_dim,), dtype=jnp.float32) * 0.05

    # One-time init-time weight prep (fuse / pad / bf16 cast / scale fold).
    params = prepare_attention_params(wq, wk, wv, wo, bo,
                                      heads=heads, dim_head=dim_head)

    out = attention_forward(x, params)
    out = jax.block_until_ready(out)

    ref = attention_reference(x, wq, wk, wv, wo, bo,
                              heads=heads, dim_head=dim_head)
    # Intentional mixed precision: bf16 MXU operands with f32 accumulation,
    # f32 softmax stats, and the approx EUP reciprocal -> loosened tolerance.
    assert out.shape == ref.shape
    assert jnp.allclose(out, ref, atol=2e-2, rtol=2e-2), "mismatch vs. reference"

    print("KERNEL_OK")
</pallas_src>

<mosaic_0001>
module attributes {stable_mosaic.version = 11 : i64} {
  func.func @_attn_kernel(%arg0: i32, %arg1: memref<2x8x32xbf16, #tpu.memory_space<vmem>>, %arg2: memref<32x768xbf16, #tpu.memory_space<vmem>>, %arg3: memref<256x32xbf16, #tpu.memory_space<vmem>>, %arg4: memref<1x32xf32, #tpu.memory_space<vmem>>, %arg5: memref<2x8x32xf32, #tpu.memory_space<vmem>>) attributes {dimension_semantics = [#tpu.dimension_semantics<parallel>], iteration_bounds = array<i64: 1>, scalar_prefetch = 0 : i64, scratch_operands = 0 : i64, tpu.core_type = #tpu.core_type<tc>, window_params = [{transform_indices = @transform_0, window_bounds = array<i64: 2, 8, 32>}, {pipeline_mode = #tpu.pipeline_mode<synchronous>, transform_indices = @transform_1, window_bounds = array<i64: 32, 768>}, {pipeline_mode = #tpu.pipeline_mode<synchronous>, transform_indices = @transform_2, window_bounds = array<i64: 256, 32>}, {pipeline_mode = #tpu.pipeline_mode<synchronous>, transform_indices = @transform_3, window_bounds = array<i64: 1, 32>}, {transform_indices = @transform_4, window_bounds = array<i64: 2, 8, 32>}]} {
    %c0 = arith.constant 0 : index
    %c0_0 = arith.constant 0 : index
    %c0_1 = arith.constant 0 : index
    %0 = vector.load %arg1[%c0, %c0_0, %c0_1] : memref<2x8x32xbf16, #tpu.memory_space<vmem>>, vector<1x8x32xbf16>
    %1 = vector.shape_cast %0 : vector<1x8x32xbf16> to vector<8x32xbf16>
    %c0_2 = arith.constant 0 : index
    %c0_3 = arith.constant 0 : index
    %2 = vector.load %arg2[%c0_2, %c0_3] : memref<32x768xbf16, #tpu.memory_space<vmem>>, vector<32x768xbf16>
    %cst = arith.constant dense<0.000000e+00> : vector<8x768xf32>
    %3 = tpu.matmul %1, %2, %cst {dimension_numbers = #tpu.dot_dimension_numbers<[1], [0], [0], [1], [0, 0, 1, 1], [], []>} : vector<8x32xbf16>, vector<32x768xbf16>, vector<8x768xf32> -> vector<8x768xf32>
    %cst_4 = arith.constant 0.000000e+00 : f32
    %4 = vector.broadcast %cst_4 : f32 to vector<8x32xf32>
    %c0_5 = arith.constant 0 : index
    %c0_6 = arith.constant 0 : index
    %5 = vector.load %arg4[%c0_5, %c0_6] : memref<1x32xf32, #tpu.memory_space<vmem>>, vector<1x32xf32>
    %6 = vector.broadcast %5 : vector<1x32xf32> to vector<8x32xf32>
    %7 = arith.addf %4, %6 : vector<8x32xf32>
    %8 = vector.extract_strided_slice %3 {offsets = [0, 0], sizes = [8, 128], strides = [1, 1]} : vector<8x768xf32> to vector<8x128xf32>
    %9 = arith.truncf %8 : vector<8x128xf32> to vector<8x128xbf16>
    %10 = vector.extract_strided_slice %3 {offsets = [0, 128], sizes = [8, 128], strides = [1, 1]} : vector<8x768xf32> to vector<8x128xf32>
    %11 = arith.truncf %10 : vector<8x128xf32> to vector<8x128xbf16>
    %12 = vector.extract_strided_slice %3 {offsets = [0, 256], sizes = [8, 128], strides = [1, 1]} : vector<8x768xf32> to vector<8x128xf32>
    %13 = arith.truncf %12 : vector<8x128xf32> to vector<8x128xbf16>
    %cst_7 = arith.constant dense<0.000000e+00> : vector<8x8xf32>
    %14 = tpu.matmul %9, %11, %cst_7 {dimension_numbers = #tpu.dot_dimension_numbers<[1], [1], [0], [0], [0, 0, 1, 0], [], []>} : vector<8x128xbf16>, vector<8x128xbf16>, vector<8x8xf32> -> vector<8x8xf32>
    %cst_8 = arith.constant dense<0xFF800000> : vector<8xf32>
    %15 = vector.multi_reduction <maximumf>, %14, %cst_8 [1] : vector<8x8xf32> to vector<8xf32>
    %16 = vector.shape_cast %15 : vector<8xf32> to vector<8x1xf32>
    %17 = vector.broadcast %16 : vector<8x1xf32> to vector<8x8xf32>
    %18 = arith.subf %14, %17 : vector<8x8xf32>
    %19 = math.exp %18 : vector<8x8xf32>
    %cst_9 = arith.constant dense<0.000000e+00> : vector<8xf32>
    %20 = vector.multi_reduction <add>, %19, %cst_9 [1] : vector<8x8xf32> to vector<8xf32>
    %21 = vector.shape_cast %20 : vector<8xf32> to vector<8x1xf32>
    %22 = tpu.reciprocal %21 {approx = true} : vector<8x1xf32> -> vector<8x1xf32>
    %23 = vector.broadcast %22 : vector<8x1xf32> to vector<8x8xf32>
    %24 = arith.mulf %19, %23 : vector<8x8xf32>
    %25 = arith.truncf %24 : vector<8x8xf32> to vector<8x8xbf16>
    %cst_10 = arith.constant dense<0.000000e+00> : vector<8x128xf32>
    %26 = tpu.matmul %25, %13, %cst_10 {dimension_numbers = #tpu.dot_dimension_numbers<[1], [0], [0], [1], [0, 0, 1, 1], [], []>} : vector<8x8xbf16>, vector<8x128xbf16>, vector<8x128xf32> -> vector<8x128xf32>
    %27 = arith.truncf %26 : vector<8x128xf32> to vector<8x128xbf16>
    %c0_11 = arith.constant 0 : index
    %c0_12 = arith.constant 0 : index
    %28 = vector.load %arg3[%c0_11, %c0_12] : memref<256x32xbf16, #tpu.memory_space<vmem>>, vector<128x32xbf16>
    %cst_13 = arith.constant dense<0.000000e+00> : vector<8x32xf32>
    %29 = tpu.matmul %27, %28, %cst_13 {dimension_numbers = #tpu.dot_dimension_numbers<[1], [0], [0], [1], [0, 0, 1, 1], [], []>} : vector<8x128xbf16>, vector<128x32xbf16>, vector<8x32xf32> -> vector<8x32xf32>
    %30 = arith.addf %7, %29 : vector<8x32xf32>
    %31 = vector.extract_strided_slice %3 {offsets = [0, 384], sizes = [8, 128], strides = [1, 1]} : vector<8x768xf32> to vector<8x128xf32>
    %32 = arith.truncf %31 : vector<8x128xf32> to vector<8x128xbf16>
    %33 = vector.extract_strided_slice %3 {offsets = [0, 512], sizes = [8, 128], strides = [1, 1]} : vector<8x768xf32> to vector<8x128xf32>
    %34 = arith.truncf %33 : vector<8x128xf32> to vector<8x128xbf16>
    %35 = vector.extract_strided_slice %3 {offsets = [0, 640], sizes = [8, 128], strides = [1, 1]} : vector<8x768xf32> to vector<8x128xf32>
    %36 = arith.truncf %35 : vector<8x128xf32> to vector<8x128xbf16>
    %cst_14 = arith.constant dense<0.000000e+00> : vector<8x8xf32>
    %37 = tpu.matmul %32, %34, %cst_14 {dimension_numbers = #tpu.dot_dimension_numbers<[1], [1], [0], [0], [0, 0, 1, 0], [], []>} : vector<8x128xbf16>, vector<8x128xbf16>, vector<8x8xf32> -> vector<8x8xf32>
    %cst_15 = arith.constant dense<0xFF800000> : vector<8xf32>
    %38 = vector.multi_reduction <maximumf>, %37, %cst_15 [1] : vector<8x8xf32> to vector<8xf32>
    %39 = vector.shape_cast %38 : vector<8xf32> to vector<8x1xf32>
    %40 = vector.broadcast %39 : vector<8x1xf32> to vector<8x8xf32>
    %41 = arith.subf %37, %40 : vector<8x8xf32>
    %42 = math.exp %41 : vector<8x8xf32>
    %cst_16 = arith.constant dense<0.000000e+00> : vector<8xf32>
    %43 = vector.multi_reduction <add>, %42, %cst_16 [1] : vector<8x8xf32> to vector<8xf32>
    %44 = vector.shape_cast %43 : vector<8xf32> to vector<8x1xf32>
    %45 = tpu.reciprocal %44 {approx = true} : vector<8x1xf32> -> vector<8x1xf32>
    %46 = vector.broadcast %45 : vector<8x1xf32> to vector<8x8xf32>
    %47 = arith.mulf %42, %46 : vector<8x8xf32>
    %48 = arith.truncf %47 : vector<8x8xf32> to vector<8x8xbf16>
    %cst_17 = arith.constant dense<0.000000e+00> : vector<8x128xf32>
    %49 = tpu.matmul %48, %36, %cst_17 {dimension_numbers = #tpu.dot_dimension_numbers<[1], [0], [0], [1], [0, 0, 1, 1], [], []>} : vector<8x8xbf16>, vector<8x128xbf16>, vector<8x128xf32> -> vector<8x128xf32>
    %50 = arith.truncf %49 : vector<8x128xf32> to vector<8x128xbf16>
    %c128 = arith.constant 128 : index
    %c0_18 = arith.constant 0 : index
    %51 = vector.load %arg3[%c128, %c0_18] : memref<256x32xbf16, #tpu.memory_space<vmem>>, vector<128x32xbf16>
    %cst_19 = arith.constant dense<0.000000e+00> : vector<8x32xf32>
    %52 = tpu.matmul %50, %51, %cst_19 {dimension_numbers = #tpu.dot_dimension_numbers<[1], [0], [0], [1], [0, 0, 1, 1], [], []>} : vector<8x128xbf16>, vector<128x32xbf16>, vector<8x32xf32> -> vector<8x32xf32>
    %53 = arith.addf %30, %52 : vector<8x32xf32>
    %c0_20 = arith.constant 0 : index
    %c0_21 = arith.constant 0 : index
    %c0_22 = arith.constant 0 : index
    %54 = vector.load %arg5[%c0_20, %c0_21, %c0_22] : memref<2x8x32xf32, #tpu.memory_space<vmem>>, vector<1x8x32xf32>
    %55 = vector.shape_cast %54 : vector<1x8x32xf32> to vector<8x32xf32>
    %56 = vector.shape_cast %53 : vector<8x32xf32> to vector<1x8x32xf32>
    tpu.vector_store %arg5[%c0_20, %c0_21, %c0_22], %56 {strides = array<i32>} : memref<2x8x32xf32, #tpu.memory_space<vmem>>, vector<1x8x32xf32>,
    %c1 = arith.constant 1 : index
    %c0_23 = arith.constant 0 : index
    %c0_24 = arith.constant 0 : index
    %57 = vector.load %arg1[%c1, %c0_23, %c0_24] : memref<2x8x32xbf16, #tpu.memory_space<vmem>>, vector<1x8x32xbf16>
    %58 = vector.shape_cast %57 : vector<1x8x32xbf16> to vector<8x32xbf16>
    %c0_25 = arith.constant 0 : index
    %c0_26 = arith.constant 0 : index
    %59 = vector.load %arg2[%c0_25, %c0_26] : memref<32x768xbf16, #tpu.memory_space<vmem>>, vector<32x768xbf16>
    %cst_27 = arith.constant dense<0.000000e+00> : vector<8x768xf32>
    %60 = tpu.matmul %58, %59, %cst_27 {dimension_numbers = #tpu.dot_dimension_numbers<[1], [0], [0], [1], [0, 0, 1, 1], [], []>} : vector<8x32xbf16>, vector<32x768xbf16>, vector<8x768xf32> -> vector<8x768xf32>
    %cst_28 = arith.constant 0.000000e+00 : f32
    %61 = vector.broadcast %cst_28 : f32 to vector<8x32xf32>
    %c0_29 = arith.constant 0 : index
    %c0_30 = arith.constant 0 : index
    %62 = vector.load %arg4[%c0_29, %c0_30] : memref<1x32xf32, #tpu.memory_space<vmem>>, vector<1x32xf32>
    %63 = vector.broadcast %62 : vector<1x32xf32> to vector<8x32xf32>
    %64 = arith.addf %61, %63 : vector<8x32xf32>
    %65 = vector.extract_strided_slice %60 {offsets = [0, 0], sizes = [8, 128], strides = [1, 1]} : vector<8x768xf32> to vector<8x128xf32>
    %66 = arith.truncf %65 : vector<8x128xf32> to vector<8x128xbf16>
    %67 = vector.extract_strided_slice %60 {offsets = [0, 128], sizes = [8, 128], strides = [1, 1]} : vector<8x768xf32> to vector<8x128xf32>
    %68 = arith.truncf %67 : vector<8x128xf32> to vector<8x128xbf16>
    %69 = vector.extract_strided_slice %60 {offsets = [0, 256], sizes = [8, 128], strides = [1, 1]} : vector<8x768xf32> to vector<8x128xf32>
    %70 = arith.truncf %69 : vector<8x128xf32> to vector<8x128xbf16>
    %cst_31 = arith.constant dense<0.000000e+00> : vector<8x8xf32>
    %71 = tpu.matmul %66, %68, %cst_31 {dimension_numbers = #tpu.dot_dimension_numbers<[1], [1], [0], [0], [0, 0, 1, 0], [], []>} : vector<8x128xbf16>, vector<8x128xbf16>, vector<8x8xf32> -> vector<8x8xf32>
    %cst_32 = arith.constant dense<0xFF800000> : vector<8xf32>
    %72 = vector.multi_reduction <maximumf>, %71, %cst_32 [1] : vector<8x8xf32> to vector<8xf32>
    %73 = vector.shape_cast %72 : vector<8xf32> to vector<8x1xf32>
    %74 = vector.broadcast %73 : vector<8x1xf32> to vector<8x8xf32>
    %75 = arith.subf %71, %74 : vector<8x8xf32>
    %76 = math.exp %75 : vector<8x8xf32>
    %cst_33 = arith.constant dense<0.000000e+00> : vector<8xf32>
    %77 = vector.multi_reduction <add>, %76, %cst_33 [1] : vector<8x8xf32> to vector<8xf32>
    %78 = vector.shape_cast %77 : vector<8xf32> to vector<8x1xf32>
    %79 = tpu.reciprocal %78 {approx = true} : vector<8x1xf32> -> vector<8x1xf32>
    %80 = vector.broadcast %79 : vector<8x1xf32> to vector<8x8xf32>
    %81 = arith.mulf %76, %80 : vector<8x8xf32>
    %82 = arith.truncf %81 : vector<8x8xf32> to vector<8x8xbf16>
    %cst_34 = arith.constant dense<0.000000e+00> : vector<8x128xf32>
    %83 = tpu.matmul %82, %70, %cst_34 {dimension_numbers = #tpu.dot_dimension_numbers<[1], [0], [0], [1], [0, 0, 1, 1], [], []>} : vector<8x8xbf16>, vector<8x128xbf16>, vector<8x128xf32> -> vector<8x128xf32>
    %84 = arith.truncf %83 : vector<8x128xf32> to vector<8x128xbf16>
    %c0_35 = arith.constant 0 : index
    %c0_36 = arith.constant 0 : index
    %85 = vector.load %arg3[%c0_35, %c0_36] : memref<256x32xbf16, #tpu.memory_space<vmem>>, vector<128x32xbf16>
    %cst_37 = arith.constant dense<0.000000e+00> : vector<8x32xf32>
    %86 = tpu.matmul %84, %85, %cst_37 {dimension_numbers = #tpu.dot_dimension_numbers<[1], [0], [0], [1], [0, 0, 1, 1], [], []>} : vector<8x128xbf16>, vector<128x32xbf16>, vector<8x32xf32> -> vector<8x32xf32>
    %87 = arith.addf %64, %86 : vector<8x32xf32>
    %88 = vector.extract_strided_slice %60 {offsets = [0, 384], sizes = [8, 128], strides = [1, 1]} : vector<8x768xf32> to vector<8x128xf32>
    %89 = arith.truncf %88 : vector<8x128xf32> to vector<8x128xbf16>
    %90 = vector.extract_strided_slice %60 {offsets = [0, 512], sizes = [8, 128], strides = [1, 1]} : vector<8x768xf32> to vector<8x128xf32>
    %91 = arith.truncf %90 : vector<8x128xf32> to vector<8x128xbf16>
    %92 = vector.extract_strided_slice %60 {offsets = [0, 640], sizes = [8, 128], strides = [1, 1]} : vector<8x768xf32> to vector<8x128xf32>
    %93 = arith.truncf %92 : vector<8x128xf32> to vector<8x128xbf16>
    %cst_38 = arith.constant dense<0.000000e+00> : vector<8x8xf32>
    %94 = tpu.matmul %89, %91, %cst_38 {dimension_numbers = #tpu.dot_dimension_numbers<[1], [1], [0], [0], [0, 0, 1, 0], [], []>} : vector<8x128xbf16>, vector<8x128xbf16>, vector<8x8xf32> -> vector<8x8xf32>
    %cst_39 = arith.constant dense<0xFF800000> : vector<8xf32>
    %95 = vector.multi_reduction <maximumf>, %94, %cst_39 [1] : vector<8x8xf32> to vector<8xf32>
    %96 = vector.shape_cast %95 : vector<8xf32> to vector<8x1xf32>
    %97 = vector.broadcast %96 : vector<8x1xf32> to vector<8x8xf32>
    %98 = arith.subf %94, %97 : vector<8x8xf32>
    %99 = math.exp %98 : vector<8x8xf32>
    %cst_40 = arith.constant dense<0.000000e+00> : vector<8xf32>
    %100 = vector.multi_reduction <add>, %99, %cst_40 [1] : vector<8x8xf32> to vector<8xf32>
    %101 = vector.shape_cast %100 : vector<8xf32> to vector<8x1xf32>
    %102 = tpu.reciprocal %101 {approx = true} : vector<8x1xf32> -> vector<8x1xf32>
    %103 = vector.broadcast %102 : vector<8x1xf32> to vector<8x8xf32>
    %104 = arith.mulf %99, %103 : vector<8x8xf32>
    %105 = arith.truncf %104 : vector<8x8xf32> to vector<8x8xbf16>
    %cst_41 = arith.constant dense<0.000000e+00> : vector<8x128xf32>
    %106 = tpu.matmul %105, %93, %cst_41 {dimension_numbers = #tpu.dot_dimension_numbers<[1], [0], [0], [1], [0, 0, 1, 1], [], []>} : vector<8x8xbf16>, vector<8x128xbf16>, vector<8x128xf32> -> vector<8x128xf32>
    %107 = arith.truncf %106 : vector<8x128xf32> to vector<8x128xbf16>
    %c128_42 = arith.constant 128 : index
    %c0_43 = arith.constant 0 : index
    %108 = vector.load %arg3[%c128_42, %c0_43] : memref<256x32xbf16, #tpu.memory_space<vmem>>, vector<128x32xbf16>
    %cst_44 = arith.constant dense<0.000000e+00> : vector<8x32xf32>
    %109 = tpu.matmul %107, %108, %cst_44 {dimension_numbers = #tpu.dot_dimension_numbers<[1], [0], [0], [1], [0, 0, 1, 1], [], []>} : vector<8x128xbf16>, vector<128x32xbf16>, vector<8x32xf32> -> vector<8x32xf32>
    %110 = arith.addf %87, %109 : vector<8x32xf32>
    %c1_45 = arith.constant 1 : index
    %c0_46 = arith.constant 0 : index
    %c0_47 = arith.constant 0 : index
    %111 = vector.load %arg5[%c1_45, %c0_46, %c0_47] : memref<2x8x32xf32, #tpu.memory_space<vmem>>, vector<1x8x32xf32>
    %112 = vector.shape_cast %111 : vector<1x8x32xf32> to vector<8x32xf32>
    %113 = vector.shape_cast %110 : vector<8x32xf32> to vector<1x8x32xf32>
    tpu.vector_store %arg5[%c1_45, %c0_46, %c0_47], %113 {strides = array<i32>} : memref<2x8x32xf32, #tpu.memory_space<vmem>>, vector<1x8x32xf32>,
    return
  }
  func.func @transform_0(%arg0: i32) -> (i32, i32, i32) {
    %c0_i32 = arith.constant 0 : i32
    %c0_i32_0 = arith.constant 0 : i32
    %c0_i32_1 = arith.constant 0 : i32
    return %arg0, %c0_i32, %c0_i32_0 : i32, i32, i32
  }
  func.func @transform_1(%arg0: i32) -> (i32, i32) {
    %c0_i32 = arith.constant 0 : i32
    %c0_i32_0 = arith.constant 0 : i32
    %c0_i32_1 = arith.constant 0 : i32
    return %c0_i32, %c0_i32_0 : i32, i32
  }
  func.func @transform_2(%arg0: i32) -> (i32, i32) {
    %c0_i32 = arith.constant 0 : i32
    %c0_i32_0 = arith.constant 0 : i32
    %c0_i32_1 = arith.constant 0 : i32
    return %c0_i32, %c0_i32_0 : i32, i32
  }
  func.func @transform_3(%arg0: i32) -> (i32, i32) {
    %c0_i32 = arith.constant 0 : i32
    %c0_i32_0 = arith.constant 0 : i32
    %c0_i32_1 = arith.constant 0 : i32
    return %c0_i32, %c0_i32_0 : i32, i32
  }
  func.func @transform_4(%arg0: i32) -> (i32, i32, i32) {
    %c0_i32 = arith.constant 0 : i32
    %c0_i32_0 = arith.constant 0 : i32
    %c0_i32_1 = arith.constant 0 : i32
    return %arg0, %c0_i32, %c0_i32_0 : i32, i32, i32
  }
}

</mosaic_0001>

<bundles_post_ra>
// kernel: tpu_custom_call.1
= control target key start
LH: loop header
LB: loop body
LE: loop exit
PB: predicated region body
PF: predicated region fallthrough
CT: control target
= control target key end

     0   :  { %vm92_vm0 = vcmask 261120   ;;  %s1531_s0 = inlined_call_operand.vmem [shape: bf16[2,8,32], index: 0, kind: input, shape index: {}]   ;;  %s1532_s1 = inlined_call_operand.vmem [shape: bf16[32,768], index: 1, kind: input, shape index: {}]   ;;  %s1533_s2 = inlined_call_operand.vmem [shape: bf16[256,32], index: 2, kind: input, shape index: {}]   ;;  %s1534_s3 = inlined_call_operand.vmem [shape: f32[1,32], index: 3, kind: input, shape index: {}]   ;;  %s1535_s4 = inlined_call_operand.hbm [shape: f32[2,8,32], index: 4, kind: output, shape index: {}]  }
   0x1   :  { %v892_v0 = vld [vmem:[%s1532_s1 + $0x30] sm:$0xf]  ;;  %v1116_v1 = vld [vmem:[%s1532_s1 + $0x44] sm:$0xf0]  ;;  %v1113_v2 = vld [vmem:[%s1532_s1 + $0x34] sm:$0xf] }
   0x2   :  { %v893_v3 = vor.u32 %v1116_v1, %v892_v0  ;;  %v894_v4 = vld [vmem:[%s1532_s1 + $0x48] sm:$0xf0]  ;;  %v868_v5 = vld [vmem:[%s1532_s1] sm:$0xf]  ;;  %v1110_v6 = vld [vmem:[%s1532_s1 + $0x14] sm:$0xf0] }
   0x3   :  { %v897_v7 = vor.u32 %v1113_v2, %v894_v4  ;;  %v1107_v8 = vld [vmem:[%s1532_s1 + $0x4] sm:$0xf]  ;;  %v870_v9 = vld [vmem:[%s1532_s1 + $0x18] sm:$0xf0]  ;;  %v869_v10 = vor.u32 %v1110_v6, %v868_v5  ;;  %v902_v12 = vld [vmem:[%s1532_s1 + $0x50] sm:$0xf0] }
   0x4   :  { %102 = vmatpush.bf16.msra.mxu0 %v893_v3  ;;  %v1114_v11 = vld [vmem:[%s1532_s1 + $0x3c] sm:$0xf]  ;;  %v873_v13 = vor.u32 %v1107_v8, %v870_v9  ;;  %v908_v14 = vld [vmem:[%s1532_s1 + $0x40] sm:$0xf]  ;;  %v1118_v15 = vld [vmem:[%s1532_s1 + $0x54] sm:$0xf0] }
   0x5   :  { %115 = vmatpush.bf16.msra.mxu3 %v897_v7  ;;  %v1108_v16 = vld [vmem:[%s1532_s1 + $0xc] sm:$0xf]  ;;  %v19_v17 = vld [vmem:[%s1531_s0] sm:$0xf]  ;;  %v905_v18 = vor.u32 %v1114_v11, %v902_v12  ;;  %v909_v19 = vor.u32 %v1118_v15, %v908_v14  ;;  %v878_v20 = vld [vmem:[%s1532_s1 + $0x20] sm:$0xf0] }
   0x6   :  { %v884_v21 = vld [vmem:[%s1532_s1 + $0x10] sm:$0xf]  ;;  %v1112_v22 = vld [vmem:[%s1532_s1 + $0x24] sm:$0xf0]  ;;  %v900_v23 = vld [vmem:[%s1532_s1 + $0x38] sm:$0xf] }
   0x7   :  { %v1117_v24 = vld [vmem:[%s1532_s1 + $0x4c] sm:$0xf0]  ;;  %v876_v25 = vld [vmem:[%s1532_s1 + $0x8] sm:$0xf]  ;;  %v1111_v27 = vld [vmem:[%s1532_s1 + $0x1c] sm:$0xf0]  ;;  %v885_v30 = vor.u32 %v1112_v22, %v884_v21 }
   0x8   :  { %103 = vmatpush.bf16.msra.mxu0 %v869_v10  ;;  %v901_v26 = vor.u32 %v1117_v24, %v900_v23  ;;  %v1115_v28 = vld [vmem:[%s1532_s1 + $0x44] sm:$0xf]  ;;  %v910_v29 = vld [vmem:[%s1532_s1 + $0x58] sm:$0xf0] }
   0x9   :  { %116 = vmatpush.bf16.msra.mxu3 %v873_v13  ;;  %v913_v31 = vor.u32 %v1115_v28, %v910_v29 }
   0xc   :  { %154 = vmatpush.bf16.msrb.mxu0 %v909_v19 }
   0xd   :  { %9 = vsyncpa [#allocation3], 0  ;;  %141 = vmatpush.bf16.msrb.mxu3 %v905_v18  ;;  %v881_v32 = vor.u32 %v1108_v16, %v878_v20  ;;  %128 = vmatpush.bf16.msra.mxu2 %v901_v26  ;;  %v877_v33 = vor.u32 %v1111_v27, %v876_v25  ;;  %v1109_v34 = vld [vmem:[%s1532_s1 + $0x14] sm:$0xf]  ;;  %v886_v35 = vld [vmem:[%s1532_s1 + $0x28] sm:$0xf0] }
   0xe   :  { %914 = vmatmul.msk.bf16.vlgmr.msra.gmra.mxu0 %vm92_vm0, %v19_v17  ;;  %167 = vmatpush.bf16.msra.mxu1 %v913_v31  ;;  %v889_v36 = vor.u32 %v1109_v34, %v886_v35  ;;  %vm211_vm1 = vcmask 1043456   ;;  %vm195_vm2 = vcmask 64512   ;;  %v1141_v9 = vld [vmem:[%s1532_s1 + $0x34] sm:$0xf]  ;;  %v1015_v10 = vld [vmem:[%s1532_s1 + $0x48] sm:$0xf0] }
   0xf   :  { %915 = vmatmul.msk.bf16.vlgmr.msra.gmra.mxu3 %vm92_vm0, %v19_v17  ;;  %v1018_v11 = vor.u32 %v1141_v9, %v1015_v10  ;;  %v1135_v12 = vld [vmem:[%s1532_s1 + $0x4] sm:$0xf]  ;;  %v991_v13 = vld [vmem:[%s1532_s1 + $0x18] sm:$0xf0]  ;;  %v1013_v15 = vld [vmem:[%s1532_s1 + $0x30] sm:$0xf] }
  0x10   :  { %155 = vmatpush.bf16.msrb.mxu0 %v885_v30  ;;  %v994_v14 = vor.u32 %v1135_v12, %v991_v13  ;;  %v1144_v16 = vld [vmem:[%s1532_s1 + $0x44] sm:$0xf0]  ;;  %v989_v18 = vld [vmem:[%s1532_s1] sm:$0xf]  ;;  %v1138_v19 = vld [vmem:[%s1532_s1 + $0x14] sm:$0xf0] }
  0x11   :  { %142 = vmatpush.bf16.msrb.mxu3 %v881_v32  ;;  %129 = vmatpush.bf16.msra.mxu2 %v877_v33  ;;  %v990_v20 = vor.u32 %v1138_v19, %v989_v18  ;;  %v1352_v22 = vld [vmem:[%s1531_s0 + $0x4] sm:$0xf]  ;;  %v1029_v23 = vld [vmem:[%s1532_s1 + $0x40] sm:$0xf]  ;;  %v1146_v24 = vld [vmem:[%s1532_s1 + $0x54] sm:$0xf0] }
  0x12   :  { %168 = vmatpush.bf16.msra.mxu1 %v889_v36  ;;  %v1030_v28 = vor.u32 %v1146_v24, %v1029_v23  ;;  %v1005_v30 = vld [vmem:[%s1532_s1 + $0x10] sm:$0xf]  ;;  %v1140_v31 = vld [vmem:[%s1532_s1 + $0x24] sm:$0xf0]  ;;  %v1142_v32 = vld [vmem:[%s1532_s1 + $0x3c] sm:$0xf] }
  0x13   :  { %v1023_v33 = vld [vmem:[%s1532_s1 + $0x50] sm:$0xf0]  ;;  %v1136_v35 = vld [vmem:[%s1532_s1 + $0xc] sm:$0xf]  ;;  %v999_v36 = vld [vmem:[%s1532_s1 + $0x20] sm:$0xf0] }
  0x14   :  { %916 = vmatmul.msk.bf16.vlgmr.msra.gmra.mxu2 %vm92_vm0, %v19_v17  ;;  %v1026_v34 = vor.u32 %v1142_v32, %v1023_v33  ;;  %s1210_s21 = smov [#allocation2]   ;;  %s854_s25 = sshll.u32 %s1535_s4, 4  ;;  %s855_s25 = int_to_ptr.hbm [resolvable:$true] %s854_s25 }
  0x15   :  { %919 = vmatmul.msk.bf16.vlgmr.msra.gmra.mxu1 %vm92_vm0, %v19_v17  ;;  %s852_s22 = sshll.u32 %s1210_s21, 4  ;;  %s1212_s26 = smov 8   ;;  %s853_s22 = int_to_ptr.vmem [resolvable:$true] %s852_s22 }
  0x1e   :  { %918 = vmatmul.msk.bf16.vlgmr.msrb.gmra.mxu0 %vm92_vm0, %v19_v17 }
  0x1f   :  { %917 = vmatmul.msk.bf16.vlgmr.msrb.gmra.mxu3 %vm92_vm0, %v19_v17  ;;  %v1014_v17 = vor.u32 %v1144_v16, %v1013_v15 }
  0x8b   :  { %v105_v37 = vpop.f32.mrf.mxu0 }
  0x8c   :  { %v179_v41 = vpack.c.bf16 %v105_v37, %v105_v37  ;;  %v1134_v37 = vld [vmem:[%s1533_s2 + $0x78] sm:$0xff] }
  0x92   :  { %v118_v38 = vpop.f32.mrf.mxu3  ;;  %v170_v53 = vpop.f32.mrf.mxu1 }
  0x93   :  { %v180_v39 = vpack.c.bf16 %v118_v38, %v118_v38  ;;  %v107_v40 = vpop.f32.mrf.mxu0  ;;  %v309_v54 = vpack.c.bf16 %v170_v53, %v170_v53  ;;  %v1006_v38 = vor.u32 %v1140_v31, %v1005_v30  ;;  %v1121_v53 = vld [vmem:[%s1533_s2 + $0x10] sm:$0xff] }
  0x94   :  { %v1002_v40 = vor.u32 %v1136_v35, %v999_v36 }
  0x95   :  { %189 = vmatpush.bf16.xpose.msrb.mxu2 %v180_v39  ;;  %v339_v55 = vsel %vm211_vm1, %v309_v54, 0  ;;  %v1126_v39 = vld [vmem:[%s1533_s2 + $0x38] sm:$0xff]  ;;  %v1128_v54 = vld [vmem:[%s1533_s2 + $0x48] sm:$0xff] }
  0x96   :  { %293 = vmatpush.bf16.msra.mxu0 %v1126_v39 }
  0x97   :  { %v131_v49 = vpop.f32.mrf.mxu2 }
  0x98   :  { %v181_v50 = vpack.c.bf16 %v131_v49, %v131_v49  ;;  %v1123_v49 = vld [vmem:[%s1533_s2 + $0x20] sm:$0xff] }
  0x9a   :  { %v120_v42 = vpop.f32.mrf.mxu3  ;;  %v213_v51 = vsel %vm211_vm1, %v181_v50, 0  ;;  %v172_v56 = vpop.f32.mrf.mxu1  ;;  %v1130_v50 = vld [vmem:[%s1533_s2 + $0x58] sm:$0xff] }
  0x9b   :  { %v157_v43 = vpop.f32.mrf.mxu0  ;;  %222 = vmatpush.bf16.msra.mxu3 %v213_v51  ;;  %v1122_v51 = vld [vmem:[%s1533_s2 + $0x18] sm:$0xff]  ;;  %v1120_v56 = vld [vmem:[%s1533_s2 + $0x8] sm:$0xff] }
  0x9c   :  { %v308_v44 = vpack.c.bf16 %v157_v43, %v157_v43  ;;  %190 = vmatmul.bf16.vlgmr.msrb.gmra.mxu2 %v179_v41  ;;  %v1133_v41 = vld [vmem:[%s1533_s2 + $0x70] sm:$0xff] }
  0x9d   :  { %348 = vmatpush.bf16.msra.mxu2 %v339_v55  ;;  %v1125_v43 = vld [vmem:[%s1533_s2 + $0x30] sm:$0xff]  ;;  %v1127_v55 = vld [vmem:[%s1533_s2 + $0x40] sm:$0xff] }
  0x9e   :  { %317 = vmatpush.bf16.xpose.msrb.mxu1 %v308_v44  ;;  %294 = vmatpush.bf16.msra.mxu0 %v1125_v43 }
  0x9f   :  { %v133_v52 = vpop.f32.mrf.mxu2  ;;  %419 = vmatpush.bf16.msrb.mxu3 %v1134_v37 }
  0xa0   :  { %v1129_v52 = vld [vmem:[%s1533_s2 + $0x50] sm:$0xff] }
  0xa1   :  { %530 = vmatpush.bf16.msrb.mxu2 %v1018_v11 }
  0xa2   :  { %v144_v45 = vpop.f32.mrf.mxu3 }
  0xa3   :  { %v307_v46 = vpack.c.bf16 %v144_v45, %v144_v45  ;;  %v159_v47 = vpop.f32.mrf.mxu0  ;;  %420 = vmatpush.bf16.msrb.mxu3 %v1133_v41 }
  0xa4   :  { %v1124_v47 = vld [vmem:[%s1533_s2 + $0x28] sm:$0xff] }
  0xa5   :  { %318 = vmatmul.bf16.vlgmr.msrb.gmra.mxu1 %v307_v46  ;;  %531 = vmatpush.bf16.msrb.mxu2 %v994_v14  ;;  %v1132_v46 = vld [vmem:[%s1533_s2 + $0x68] sm:$0xff] }
  0xa6   :  { %517 = vmatpush.bf16.msra.mxu1 %v1014_v17  ;;  %295 = vmatpush.bf16.msra.mxu0 %v1124_v47 }
  0xa7   :  { %421 = vmatpush.bf16.msrb.mxu3 %v1132_v46 }
  0xaa   :  { %v146_v48 = vpop.f32.mrf.mxu3  ;;  %518 = vmatpush.bf16.msra.mxu1 %v990_v20  ;;  %296 = vmatpush.bf16.msra.mxu0 %v1123_v49 }
  0xab   :  { %v1131_v48 = vld [vmem:[%s1533_s2 + $0x60] sm:$0xff] }
  0xac   :  { %422 = vmatpush.bf16.msrb.mxu3 %v1131_v48 }
  0xae   :  { %556 = vmatpush.bf16.msrb.mxu1 %v1026_v34  ;;  %297 = vmatpush.bf16.msra.mxu0 %v1122_v51 }
  0xb0   :  { %423 = vmatpush.bf16.msrb.mxu3 %v1130_v50 }
  0xb2   :  { %557 = vmatpush.bf16.msrb.mxu1 %v1002_v40  ;;  %298 = vmatpush.bf16.msra.mxu0 %v1121_v53 }
  0xb4   :  { %424 = vmatpush.bf16.msrb.mxu3 %v1129_v52 }
  0xb5   :  { %1035 = vmatmul.msk.bf16.vlgmr.msra.gmra.mxu1 %vm92_vm0, %v1352_v22 }
  0xb6   :  { %299 = vmatpush.bf16.msra.mxu0 %v1120_v56  ;;  %v1162_v56 = vld [vmem:[%s1533_s2 + $0x78] sm:$0xff] }
  0xb8   :  { %425 = vmatpush.bf16.msrb.mxu3 %v1128_v54 }
  0xbc   :  { %426 = vmatpush.bf16.msrb.mxu3 %v1127_v55  ;;  %v1154_v55 = vld [vmem:[%s1533_s2 + $0x38] sm:$0xff] }
  0xc5   :  { %1038 = vmatmul.msk.bf16.vlgmr.msrb.gmra.mxu1 %vm92_vm0, %v1352_v22 }
 0x11f   :  { %v191_v57 = vpop.f32.mrf.mxu2 }
 0x120   :  { %v196_v62 = vsel %vm195_vm2, %v191_v57, -inf }
 0x122   :  { %v319_v58 = vpop.f32.mrf.mxu1 }
 0x123   :  { %v323_v59 = vsel %vm195_vm2, %v319_v58, -inf }
 0x124   :  { %324 = vmax.xlane.f32.xlu0 %v323_v59  ;;  %v1031_v59 = vld [vmem:[%s1532_s1 + $0x58] sm:$0xf0] }
 0x127   :  { %v193_v60 = vpop.f32.mrf.mxu2 }
 0x12a   :  { %v321_v61 = vpop.f32.mrf.mxu1 }
 0x12b   :  { %v1021_v61 = vld [vmem:[%s1532_s1 + $0x38] sm:$0xf] }
 0x12c   :  { %197 = vmax.xlane.f32.xlu0 %v196_v62  ;;  %v1145_v62 = vld [vmem:[%s1532_s1 + $0x4c] sm:$0xf0] }
 0x197   :  { %v325_v63 = vpop.xlane.xlu0 %324 }
 0x198   :  { %v326_v0 = vsub.f32 %v319_v58, %v325_v63  ;;  %v1143_v58 = vld [vmem:[%s1532_s1 + $0x44] sm:$0xf]  ;;  %v1022_v63 = vor.u32 %v1145_v62, %v1021_v61 }
 0x199   :  { %v1034_v60 = vor.u32 %v1143_v58, %v1031_v59  ;;  %v1161_v58 = vld [vmem:[%s1533_s2 + $0x70] sm:$0xff]  ;;  %v1152_v59 = vld [vmem:[%s1533_s2 + $0x28] sm:$0xff]  ;;  %v1151_v61 = vld [vmem:[%s1533_s2 + $0x20] sm:$0xff] }
 0x19a   :  { %v327_v1 = vmul.f32 1.442695, %v326_v0  ;;  %v1137_v0 = vld [vmem:[%s1532_s1 + $0x14] sm:$0xf]  ;;  %v1159_v62 = vld [vmem:[%s1533_s2 + $0x60] sm:$0xff] }
 0x19c   :  { %1168 = vpow2.f32 %v327_v1  ;;  %v1007_v1 = vld [vmem:[%s1532_s1 + $0x28] sm:$0xf0] }
 0x19f   :  { %v198_v2 = vpop.xlane.xlu0 %197 }
 0x1a0   :  { %v199_v3 = vsub.f32 %v191_v57, %v198_v2  ;;  %v1119_v57 = vld [vmem:[%s1533_s2] sm:$0xff]  ;;  %v997_v2 = vld [vmem:[%s1532_s1 + $0x8] sm:$0xf] }
 0x1a1   :  { %300 = vmatpush.bf16.msra.mxu0 %v1119_v57  ;;  %v1153_v57 = vld [vmem:[%s1533_s2 + $0x30] sm:$0xff] }
 0x1a2   :  { %v1169_v4 = vpop.eup %1168  ;;  %v200_v5 = vmul.f32 1.442695, %v199_v3  ;;  %v1139_v3 = vld [vmem:[%s1532_s1 + $0x1c] sm:$0xf0] }
 0x1a3   :  { %v329_v6 = vsel %vm195_vm2, %v1169_v4, 0.0 }
 0x1a4   :  { %1170 = vpow2.f32 %v200_v5  ;;  %330 = vadd.xlane.f32.xlu1 %v329_v6  ;;  %v998_v5 = vor.u32 %v1139_v3, %v997_v2  ;;  %v520_v6 = vpop.f32.mrf.mxu1  ;;  %v1149_v2 = vld [vmem:[%s1533_s2 + $0x10] sm:$0xff] }
 0x1a5   :  { %543 = vmatpush.bf16.msrb.mxu0 %v1022_v63  ;;  %v594_v24 = vpack.c.bf16 %v520_v6, %v520_v6 }
 0x1a9   :  { %544 = vmatpush.bf16.msrb.mxu0 %v998_v5 }
 0x1aa   :  { %v1171_v7 = vpop.eup %1170 }
 0x1ab   :  { %v202_v8 = vsel %vm195_vm2, %v1171_v7, 0.0 }
 0x1ac   :  { %203 = vadd.xlane.f32.xlu1 %v202_v8 }
 0x217   :  { %v331_v21 = vpop.xlane.xlu1 %330 }
 0x218   :  { %1172 = vrcp.f32 %v331_v21 }
 0x21e   :  { %v1173_v25 = vpop.eup %1172 }
 0x21f   :  { %v333_v26 = vmul.f32 %v1173_v25, %v1169_v4  ;;  %v204_v27 = vpop.xlane.xlu1 %203  ;;  %v1010_v4 = vor.u32 %v1137_v0, %v1007_v1  ;;  %v1166_v25 = vld [vmem:[%s1534_s3] ss:$0 sm:$0xff]  ;;  %v1150_v0 = vld [vmem:[%s1533_s2 + $0x18] sm:$0xff] }
 0x220   :  { %1174 = vrcp.f32 %v204_v27  ;;  %v1158_v1 = vld [vmem:[%s1533_s2 + $0x58] sm:$0xff] }
 0x221   :  { %v334_v29 = vpack.c.bf16 %v333_v26, %v333_v26 }
 0x223   :  { %953 = vmatmul.msk.bf16.vlgmr.msra.gmra.mxu2 %vm195_vm2, %v334_v29 }
 0x224   :  { %569 = vmatpush.bf16.msra.mxu2 %v1030_v28 }
 0x226   :  { %v1175_v42 = vpop.eup %1174 }
 0x227   :  { %v206_v44 = vmul.f32 %v1175_v42, %v1171_v7  ;;  %v522_v7 = vpop.f32.mrf.mxu1 }
 0x228   :  { %570 = vmatpush.bf16.msra.mxu2 %v1006_v38  ;;  %v1148_v7 = vld [vmem:[%s1533_s2 + $0x8] sm:$0xff] }
 0x229   :  { %v207_v45 = vpack.c.bf16 %v206_v44, %v206_v44 }
 0x22b   :  { %920 = vmatmul.msk.bf16.vlgmr.msra.gmra.mxu3 %vm195_vm2, %v207_v45 }
 0x22c   :  { %582 = vmatpush.bf16.msra.mxu3 %v1034_v60  ;;  %v1160_v60 = vld [vmem:[%s1533_s2 + $0x68] sm:$0xff] }
 0x22f   :  { %v559_v10 = vpop.f32.mrf.mxu1 }
 0x230   :  { %583 = vmatpush.bf16.msra.mxu3 %v1010_v4  ;;  %v720_v21 = vpack.c.bf16 %v559_v10, %v559_v10 }
 0x233   :  { %1036 = vmatmul.msk.bf16.vlgmr.msrb.gmra.mxu2 %vm92_vm0, %v1352_v22 }
 0x234   :  { %706 = vmatpush.bf16.msrb.mxu2 %v1154_v55 }
 0x237   :  { %v561_v14 = vpop.f32.mrf.mxu1 }
 0x238   :  { %707 = vmatpush.bf16.msrb.mxu2 %v1153_v57  ;;  %v1155_v14 = vld [vmem:[%s1533_s2 + $0x40] sm:$0xff] }
 0x23c   :  { %708 = vmatpush.bf16.msrb.mxu2 %v1152_v59 }
 0x240   :  { %709 = vmatpush.bf16.msrb.mxu2 %v1151_v61 }
 0x243   :  { %1039 = vmatmul.msk.bf16.vlgmr.msra.gmra.mxu2 %vm92_vm0, %v1352_v22 }
 0x244   :  { %710 = vmatpush.bf16.msrb.mxu2 %v1150_v0 }
 0x248   :  { %711 = vmatpush.bf16.msrb.mxu2 %v1149_v2 }
 0x24c   :  { %712 = vmatpush.bf16.msrb.mxu2 %v1148_v7 }
 0x2a6   :  { %v350_v8 = vpop.f32.mrf.mxu2 }
 0x2a7   :  { %v354_v9 = vpack.c.bf16 %v350_v8, %v350_v8 }
 0x2a9   :  { %427 = vmatmul.bf16.vlgmr.msrb.gmra.mxu3 %v354_v9 }
 0x2ae   :  { %v224_v11 = vpop.f32.mrf.mxu3  ;;  %v352_v12 = vpop.f32.mrf.mxu2 }
 0x2af   :  { %v228_v13 = vpack.c.bf16 %v224_v11, %v224_v11  ;;  %v1147_v11 = vld [vmem:[%s1533_s2] sm:$0xff]  ;;  %v1157_v12 = vld [vmem:[%s1533_s2 + $0x50] sm:$0xff] }
 0x2b0   :  { %713 = vmatpush.bf16.msrb.mxu2 %v1147_v11 }
 0x2b1   :  { %301 = vmatmul.bf16.vlgmr.msra.gmra.mxu0 %v228_v13  ;;  %v1156_v13 = vld [vmem:[%s1533_s2 + $0x48] sm:$0xff]  ;;  %s1211_s2 = smov 128  }
 0x2b6   :  { %v226_v15 = vpop.f32.mrf.mxu3  ;;  %v533_v16 = vpop.f32.mrf.mxu2 }
 0x2b7   :  { %v595_v17 = vpack.c.bf16 %v533_v16, %v533_v16 }
 0x2b9   :  { %604 = vmatpush.bf16.xpose.msra.mxu0 %v595_v17  ;;  %1040 = vmatmul.msk.bf16.vlgmr.msra.gmra.mxu3 %vm92_vm0, %v1352_v22 }
 0x2be   :  { %v535_v18 = vpop.f32.mrf.mxu2 }
 0x2c1   :  { %1037 = vmatmul.msk.bf16.vlgmr.msrb.gmra.mxu0 %vm92_vm0, %v1352_v22 }
 0x2c6   :  { %v572_v19 = vpop.f32.mrf.mxu2 }
 0x2c7   :  { %v721_v20 = vpack.c.bf16 %v572_v19, %v572_v19 }
 0x2c9   :  { %730 = vmatpush.bf16.xpose.msrb.mxu3 %v721_v20 }
 0x2ce   :  { %v574_v23 = vpop.f32.mrf.mxu2 }
 0x2d0   :  { %731 = vmatmul.bf16.vlgmr.msrb.gmra.mxu3 %v720_v21  ;;  %v1167_v21 = vld [vmem:[%s1534_s3] ss:$0 sm:$0xff] }
 0x2d1   :  { %605 = vmatmul.bf16.vlgmr.msra.gmra.mxu0 %v594_v24 }
 0x32c   :  { %v428_v26 = vpop.f32.mrf.mxu3 }
 0x32e   :  { %v302_v27 = vpop.f32.mrf.mxu0 }
 0x32f   :  { %v306_v28 = vadd.f32 %v1166_v25, %v302_v27 }
 0x331   :  { %v432_v29 = vadd.f32 %v428_v26, %v306_v28 }
 0x333   :  { %433 = vst.msk [vmem:[#allocation2] sm:$0xff] %vm92_vm0, %v432_v29 }
 0x334   :  { %v430_v30 = vpop.f32.mrf.mxu3 }
 0x336   :  { %v304_v22 = vpop.f32.mrf.mxu0 }
 0x33c   :  { %v585_v31 = vpop.f32.mrf.mxu3 }
 0x33d   :  { %v722_v32 = vpack.c.bf16 %v585_v31, %v585_v31 }
 0x33e   :  { %v546_v33 = vpop.f32.mrf.mxu0 }
 0x33f   :  { %v596_v34 = vpack.c.bf16 %v546_v33, %v546_v33  ;;  %v752_v35 = vsel %vm211_vm1, %v722_v32, 0 }
 0x340   :  { %761 = vmatpush.bf16.msrb.mxu0 %v752_v35 }
 0x341   :  { %v626_v36 = vsel %vm211_vm1, %v596_v34, 0 }
 0x342   :  { %635 = vmatpush.bf16.msra.mxu1 %v626_v36 }
 0x344   :  { %v587_v37 = vpop.f32.mrf.mxu3 }
 0x346   :  { %v548_v38 = vpop.f32.mrf.mxu0  ;;  %832 = vmatpush.bf16.msrb.mxu1 %v1162_v56 }
 0x34a   :  { %833 = vmatpush.bf16.msrb.mxu1 %v1161_v58 }
 0x34e   :  { %v606_v39 = vpop.f32.mrf.mxu0  ;;  %834 = vmatpush.bf16.msrb.mxu1 %v1160_v60 }
 0x34f   :  { %v610_v40 = vsel %vm195_vm2, %v606_v39, -inf }
 0x350   :  { %611 = vmax.xlane.f32.xlu2 %v610_v40 }
 0x352   :  { %835 = vmatpush.bf16.msrb.mxu1 %v1159_v62 }
 0x353   :  { %v732_v41 = vpop.f32.mrf.mxu3 }
 0x354   :  { %v736_v42 = vsel %vm195_vm2, %v732_v41, -inf }
 0x356   :  { %v608_v43 = vpop.f32.mrf.mxu0  ;;  %836 = vmatpush.bf16.msrb.mxu1 %v1158_v1 }
 0x358   :  { %737 = vmax.xlane.f32.xlu2 %v736_v42 }
 0x35a   :  { %837 = vmatpush.bf16.msrb.mxu1 %v1157_v12 }
 0x35b   :  { %v734_v44 = vpop.f32.mrf.mxu3 }
 0x35e   :  { %838 = vmatpush.bf16.msrb.mxu1 %v1156_v13 }
 0x362   :  { %839 = vmatpush.bf16.msrb.mxu1 %v1155_v14 }
 0x3c3   :  { %v612_v45 = vpop.xlane.xlu2 %611 }
 0x3c4   :  { %v613_v46 = vsub.f32 %v606_v39, %v612_v45 }
 0x3c6   :  { %v614_v47 = vmul.f32 1.442695, %v613_v46 }
 0x3c8   :  { %1176 = vpow2.f32 %v614_v47 }
 0x3cb   :  { %v738_v48 = vpop.xlane.xlu2 %737 }
 0x3cc   :  { %v739_v49 = vsub.f32 %v732_v41, %v738_v48 }
 0x3ce   :  { %v1177_v50 = vpop.eup %1176  ;;  %v740_v51 = vmul.f32 1.442695, %v739_v49 }
 0x3cf   :  { %v616_v52 = vsel %vm195_vm2, %v1177_v50, 0.0 }
 0x3d0   :  { %1178 = vpow2.f32 %v740_v51  ;;  %617 = vadd.xlane.f32.xlu0 %v616_v52 }
 0x3d6   :  { %v1179_v53 = vpop.eup %1178 }
 0x3d7   :  { %v742_v54 = vsel %vm195_vm2, %v1179_v53, 0.0 }
 0x3d8   :  { %743 = vadd.xlane.f32.xlu1 %v742_v54 }
 0x443   :  { %v618_v63 = vpop.xlane.xlu0 %617 }
 0x444   :  { %1180 = vrcp.f32 %v618_v63 }
 0x44a   :  { %v1181_v3 = vpop.eup %1180 }
 0x44b   :  { %v620_v4 = vmul.f32 %v1181_v3, %v1177_v50  ;;  %v744_v5 = vpop.xlane.xlu1 %743 }
 0x44c   :  { %1182 = vrcp.f32 %v744_v5 }
 0x44d   :  { %v621_v6 = vpack.c.bf16 %v620_v4, %v620_v4 }
 0x44f   :  { %1041 = vmatmul.msk.bf16.vlgmr.msra.gmra.mxu1 %vm195_vm2, %v621_v6 }
 0x452   :  { %v1183_v8 = vpop.eup %1182 }
 0x453   :  { %v746_v9 = vmul.f32 %v1183_v8, %v1179_v53 }
 0x455   :  { %v747_v10 = vpack.c.bf16 %v746_v9, %v746_v9 }
 0x457   :  { %1074 = vmatmul.msk.bf16.vlgmr.msrb.gmra.mxu0 %vm195_vm2, %v747_v10 }
 0x4cc   :  { %v637_v15 = vpop.f32.mrf.mxu1 }
 0x4cd   :  { %v641_v16 = vpack.c.bf16 %v637_v15, %v637_v15 }
 0x4cf   :  { %714 = vmatmul.bf16.vlgmr.msrb.gmra.mxu2 %v641_v16 }
 0x4d4   :  { %v639_v17 = vpop.f32.mrf.mxu1  ;;  %v763_v18 = vpop.f32.mrf.mxu0 }
 0x4d5   :  { %v767_v19 = vpack.c.bf16 %v763_v18, %v763_v18 }
 0x4d7   :  { %840 = vmatmul.bf16.vlgmr.msrb.gmra.mxu1 %v767_v19 }
 0x4dc   :  { %v765_v20 = vpop.f32.mrf.mxu0 }
 0x552   :  { %v715_v23 = vpop.f32.mrf.mxu2 }
 0x553   :  { %v719_v24 = vadd.f32 %v1167_v21, %v715_v23 }
 0x554   :  { %v841_v25 = vpop.f32.mrf.mxu1 }
 0x555   :  { %v845_v26 = vadd.f32 %v841_v25, %v719_v24 }
 0x557   :  { %847 = vst.msk [vmem:[#allocation2 + $0x8] sm:$0xff] %vm92_vm0, %v845_v26 }
 0x558   :  { %860 = dma.vmem_to_hbm [thread:$0]  %s853_s22, 256, %s855_s25, [#allocation3], %s1211_s2, %s1211_s2, %s1212_s26  }
 0x55a   :  { %v717_v27 = vpop.f32.mrf.mxu2 }
 0x55c   :  { %v843_v28 = vpop.f32.mrf.mxu1 }
 0x55d   :  { %1208 = dma.done.wait [#allocation3], 256  }
 0x55e   :  { %1209 = vsyncadd [#allocation3], 4294967040 }
 0x55f   :  { %865 = vsyncpa [#allocation3], 1 }

</bundles_post_ra>
